<compile_context>
chip_gen: v6e
topology: v6e:2x2x1
jax: 0.10.0
libtpu: 0.0.40
codegen_flags: <defaults>
</compile_context>

<pallas_src>
import functools

import jax
import jax.numpy as jnp
from jax.experimental import pallas as pl
from jax.experimental.pallas import tpu as pltpu


# ----------------------------- config ---------------------------------------
class Cfg:
    BATCH = 2
    SEQ = 8            # question length
    REGIONS = 16       # image regions
    WORD_EMBED_SIZE = 32
    HIDDEN_SIZE = 32
    IMG_FEAT_SIZE = 64
    FLAT_MLP_SIZE = 64
    FLAT_GLIMPSES = 1
    FLAT_OUT_SIZE = 128
    ANSWER_SIZE = 16
    TOKEN_SIZE = 50
    ATT_STEP = 2
    RNN_STEP = 2
    NUM_ATT_OPS = 5    # len(ATT_PRIMITIVES)  (definition not provided)
    NUM_RNN_OPS = 4    # len(RNN_PRIMITIVES)  (definition not provided)
    LN_EPS = 1e-5
    # packing constants
    TOKEN_PAD = 64     # one-hot / embedding-table rows, padded (>= TOKEN_SIZE)
    OUT_PAD = 128      # lane-dense padded answer width


# ----------------------------- fused Pallas kernel ---------------------------
def fused_net_kernel(
    qix_ref,   # (B*S, 1)            int32 question token ids
    img_ref,   # (B*M, IMG_FEAT)     f32 raw image features
    w_ref,     # (384, 128)          bf16 packed weight slab (see pack_params)
    b_ref,     # (8, 128)            f32 packed bias / vector slab
    o_ref,     # (B, OUT_PAD)        f32 sigmoid outputs; answers in lanes [:ANSWER_SIZE]
    *, batch,
):
    C = Cfg
    B = batch
    BS = qix_ref.shape[0]                 # B * SEQ
    BM = img_ref.shape[0]                 # B * REGIONS
    S = BS // B
    M = BM // B
    H = C.HIDDEN_SIZE
    H2 = 2 * H                            # [lang | img] hidden lanes
    KIN = C.TOKEN_PAD + C.IMG_FEAT_SIZE   # [one-hot | img-feature] input lanes
    f32, bf16 = jnp.float32, jnp.bfloat16

    # ---- carve the packed weight slab (static ref windows -> direct loads) --
    w_in = w_ref[0:KIN, 0:H2]                                  # block-diag [emb@rnn_w ; img_w]
    w1 = w_ref[KIN:KIN + H2, :]                                # block-diag AttFlat fc1
    wm = w_ref[KIN + H2:KIN + 2 * H2, :]                       # block-diag linear_merge
    projw = w_ref[KIN + 2 * H2:KIN + 2 * H2 + C.FLAT_OUT_SIZE, :]  # padded answer proj

    bias = b_ref[...]                  # single (8,128) load
    b1 = bias[0:1, :]                  # [lang_b1 | img_b1 + img_b@img_w1]
    w2l = bias[1:2, :]                 # [lang_w2 | 0]   zero-masked G=1 score row
    w2i = bias[2:3, :]                 # [0 | img_w2]
    bm_sum = bias[3:4, :]              # lang_bm + img_bm + img_b@img_wm
    gamma = bias[4:5, :]
    beta = bias[5:6, :]
    projb = bias[6:7, :]
    b2l = bias[7:8, 0:1]               # fc2 bias scalars (G=1)
    b2i = bias[7:8, 1:2]

    # ---- embedding gather as a one-hot dot, fused with BOTH input projections
    qix = qix_ref[...]                                              # (BS, 1) int32
    lane = jax.lax.broadcasted_iota(jnp.int32, (BS, KIN), 1)
    onehot = (lane == qix).astype(f32)          # lanes >= TOKEN_PAD never match (ids < 64)
    img_raw = img_ref[...]                                          # (BM, IMG_FEAT) f32
    img_blk = jnp.concatenate(
        [jnp.zeros((BM, C.TOKEN_PAD), f32), img_raw], axis=-1)      # (BM, KIN)
    x_in = jnp.concatenate([onehot, img_blk], axis=0).astype(bf16)  # (BS+BM, KIN)

    # one MXU dot: lang rows -> [lang_hid | 0], img rows -> [0 | img_hid]
    hid = jnp.dot(x_in, w_in, preferred_element_type=f32)           # (BS+BM, H2)

    # ---- fused AttFlat MLP fc1 for both streams + ReLU (dropout = eval identity)
    h1 = jnp.maximum(
        jnp.dot(hid.astype(bf16), w1, preferred_element_type=f32) + b1, 0.0)  # (BS+BM, 128)

    # ---- G=1 attention scores: VPU multiply + lane reduce (no N=1 MXU pass) --
    # make_mask() computed in-kernel from the raw inputs; masked_fill(-1e9) is
    # folded in as an additive score bias (equivalent after softmax).
    sc_l = (jnp.sum(h1[:BS] * w2l, axis=-1, keepdims=True) + b2l
            + jnp.where(qix == 0, -1.0e9, 0.0))                                 # (BS, 1)
    img_is_pad = jnp.sum(jnp.abs(img_raw), axis=-1, keepdims=True) == 0.0
    sc_i = (jnp.sum(h1[BS:] * w2i, axis=-1, keepdims=True) + b2i
            + jnp.where(img_is_pad, -1.0e9, 0.0))                               # (BM, 1)

    # ---- per-stream softmax over tokens/regions + glimpse-weighted sum ------
    # (kept as a sublane reduce; a lane-axis softmax would need extra relayouts
    #  for only a modest cycle win at these shapes)
    def soft_glimpse(score, x_wide, n):
        s = score.reshape(B, n, 1)
        s = s - jnp.max(s, axis=1, keepdims=True)
        e = jnp.exp(s)
        att = e * pl.reciprocal(jnp.sum(e, axis=1, keepdims=True), approx=True)
        return jnp.sum(att * x_wide.reshape(B, n, H2), axis=1)                  # (B, H2)

    att_l = soft_glimpse(sc_l, hid[:BS], S)     # data in lanes [:H], zeros elsewhere
    att_i = soft_glimpse(sc_i, hid[BS:], M)     # data in lanes [H:], zeros elsewhere
    atted = att_l + att_i                       # (B, H2) == [atted_lang | atted_img]

    # ---- fused linear_merge (block-diag) also realizes lang_vec + img_vec ---
    x = jnp.dot(atted.astype(bf16), wm, preferred_element_type=f32) + bm_sum    # (B, 128)

    # ---- LayerNorm + lane-padded answer projection + sigmoid (f32 VPU/EUP) --
    mu = jnp.mean(x, axis=-1, keepdims=True)
    var = jnp.mean((x - mu) ** 2, axis=-1, keepdims=True)
    xn = (x - mu) * jax.lax.rsqrt(var + C.LN_EPS) * gamma + beta
    logits = jnp.dot(xn.astype(bf16), projw, preferred_element_type=f32) + projb
    o_ref[...] = jax.nn.sigmoid(logits)                                          # lane-dense store


# ----------------------------- parameter init (torch-like, unfused) ----------
def init_params(key):
    C = Cfg
    assert C.FLAT_GLIMPSES == 1     # kernel specializes the G=1 contractions to VPU ops
    ks = iter(jax.random.split(key, 24))

    def rnd(k, *shape, scale=0.05):
        return scale * jax.random.normal(k, shape, jnp.float32)

    p = {}
    p["embedding"] = 0.1 * jax.random.normal(
        next(ks), (C.TOKEN_SIZE, C.WORD_EMBED_SIZE), jnp.float32)
    # TODO(synk): RNN_Model_Search definition unavailable; per-token linear stand-in.
    p["rnn_w"] = rnd(next(ks), C.WORD_EMBED_SIZE, C.HIDDEN_SIZE)
    p["rnn_b"] = rnd(next(ks), C.HIDDEN_SIZE)
    p["img_w"] = rnd(next(ks), C.IMG_FEAT_SIZE, C.HIDDEN_SIZE)
    p["img_b"] = rnd(next(ks), C.HIDDEN_SIZE)
    for s in ("lang", "img"):
        p[f"af_{s}_w1"] = rnd(next(ks), C.HIDDEN_SIZE, C.FLAT_MLP_SIZE)
        p[f"af_{s}_b1"] = rnd(next(ks), C.FLAT_MLP_SIZE)
        p[f"af_{s}_w2"] = rnd(next(ks), C.FLAT_MLP_SIZE, C.FLAT_GLIMPSES)
        p[f"af_{s}_b2"] = rnd(next(ks), C.FLAT_GLIMPSES)
        p[f"af_{s}_wm"] = rnd(next(ks), C.HIDDEN_SIZE * C.FLAT_GLIMPSES, C.FLAT_OUT_SIZE)
        p[f"af_{s}_bm"] = rnd(next(ks), C.FLAT_OUT_SIZE)
    p["ln_gamma"] = 1.0 + rnd(next(ks), C.FLAT_OUT_SIZE)
    p["ln_beta"] = rnd(next(ks), C.FLAT_OUT_SIZE)
    p["proj_w"] = rnd(next(ks), C.FLAT_OUT_SIZE, C.ANSWER_SIZE)
    p["proj_b"] = rnd(next(ks), C.ANSWER_SIZE)
    # architecture alphas (parity with _init_alphas; they only feed the
    # gumbel-softmax hot vectors / Backbone, which is stubbed -> dead work).
    att_branches = sum(range(1, C.ATT_STEP + 1))
    rnn_branches = sum(range(1, C.RNN_STEP + 1))
    p["alphas_imag"] = 0.001 * jax.random.normal(next(ks), (att_branches, C.NUM_ATT_OPS))
    p["alphas_ques"] = 0.001 * jax.random.normal(next(ks), (att_branches, C.NUM_ATT_OPS))
    p["alphas_rnn"] = 0.001 * jax.random.normal(next(ks), (rnn_branches, C.NUM_RNN_OPS))
    return p


# ----------------------------- pack params into 2 kernel slabs ---------------
def pack_params(p):
    C = Cfg
    f32, bf16 = jnp.float32, jnp.bfloat16
    H, MID, FOUT = C.HIDDEN_SIZE, C.FLAT_MLP_SIZE, C.FLAT_OUT_SIZE
    FEAT, TOKP = C.IMG_FEAT_SIZE, C.TOKEN_PAD
    KIN = TOKP + FEAT
    assert C.TOKEN_SIZE <= TOKP and 2 * MID <= 128 and FOUT <= 128 and C.OUT_PAD <= 128

    # Embedding folded through the RNN stand-in (exact: each one-hot row selects
    # exactly one table row, so rnn_b folds into the table).
    emb_proj = p["embedding"] @ p["rnn_w"] + p["rnn_b"]
    emb_proj = jnp.zeros((TOKP, H), f32).at[:C.TOKEN_SIZE].set(emb_proj)

    # Block-diagonal input projection: [one-hot | img_feat] -> [lang_hid | img_hid].
    # img_feat_linear's bias is folded downstream: exactly into the fc1 bias
    # (img_b @ img_w1) and into the merge bias (img_b @ img_wm, via sum(att)==1).
    w_in = jnp.zeros((KIN, 2 * H), f32)
    w_in = w_in.at[:TOKP, :H].set(emb_proj)
    w_in = w_in.at[TOKP:, H:].set(p["img_w"])

    # Block-diagonal AttFlat fc1 (both streams in one (64,128) weight).
    w1 = jnp.zeros((2 * H, 2 * MID), f32)
    w1 = w1.at[:H, :MID].set(p["af_lang_w1"])
    w1 = w1.at[H:, MID:].set(p["af_img_w1"])
    b1_cat = jnp.concatenate(
        [p["af_lang_b1"], p["af_img_b1"] + p["img_b"] @ p["af_img_w1"]])

    # Zero-masked G=1 score rows: a full-128-lane VPU reduce stays per-stream clean.
    w2l = jnp.zeros((2 * MID,), f32).at[:MID].set(p["af_lang_w2"][:, 0])
    w2i = jnp.zeros((2 * MID,), f32).at[MID:].set(p["af_img_w2"][:, 0])

    # Block-diagonal linear_merge; its single dot also realizes lang_vec + img_vec.
    wm = jnp.zeros((2 * H, FOUT), f32)
    wm = wm.at[:H].set(p["af_lang_wm"])
    wm = wm.at[H:].set(p["af_img_wm"])
    bm_sum = p["af_lang_bm"] + p["af_img_bm"] + p["img_b"] @ p["af_img_wm"]

    # Lane-padded answer projection (lane-dense 128-wide store in the kernel).
    proj_w = jnp.zeros((FOUT, C.OUT_PAD), f32).at[:, :C.ANSWER_SIZE].set(p["proj_w"])
    proj_b = jnp.zeros((C.OUT_PAD,), f32).at[:C.ANSWER_SIZE].set(p["proj_b"])

    # ---- single bf16 weight slab: ONE HBM->VMEM DMA for all matmul weights ----
    wslab = jnp.zeros((KIN + 4 * H + FOUT, 128), f32)
    wslab = wslab.at[:KIN, :2 * H].set(w_in)
    wslab = wslab.at[KIN:KIN + 2 * H, :2 * MID].set(w1)
    wslab = wslab.at[KIN + 2 * H:KIN + 4 * H, :FOUT].set(wm)
    wslab = wslab.at[KIN + 4 * H:, :C.OUT_PAD].set(proj_w)
    wslab = wslab.astype(bf16)

    # ---- single (8,128) f32 slab for every bias / gamma / beta / score row ----
    bslab = jnp.zeros((8, 128), f32)
    bslab = bslab.at[0, :2 * MID].set(b1_cat)
    bslab = bslab.at[1, :].set(w2l)
    bslab = bslab.at[2, :].set(w2i)
    bslab = bslab.at[3, :FOUT].set(bm_sum)
    bslab = bslab.at[4, :FOUT].set(p["ln_gamma"])
    bslab = bslab.at[5, :FOUT].set(p["ln_beta"])
    bslab = bslab.at[6, :C.OUT_PAD].set(proj_b)
    bslab = bslab.at[7, 0].set(p["af_lang_b2"][0])
    bslab = bslab.at[7, 1].set(p["af_img_b2"][0])
    return {"wslab": wslab, "bslab": bslab}


# ----------------------------- forward ---------------------------------------
@jax.jit
def net_search_forward(packed, img_feat, ques_ix):
    """Single fused pallas_call.  Returns (B, OUT_PAD) sigmoid outputs; the real
    answers live in lanes [:ANSWER_SIZE] (slice left to the consumer so the
    launch-bound critical path is exactly one dispatched op)."""
    C = Cfg
    B, S = ques_ix.shape
    M = img_feat.shape[1]
    qix_col = ques_ix.reshape(B * S, 1).astype(jnp.int32)    # free row-major reshape
    img_flat = img_feat.reshape(B * M, C.IMG_FEAT_SIZE)      # free row-major reshape

    flops = (2 * (B * (S + M)) * (C.TOKEN_PAD + C.IMG_FEAT_SIZE) * 2 * C.HIDDEN_SIZE
             + 2 * (B * (S + M)) * 2 * C.HIDDEN_SIZE * 2 * C.FLAT_MLP_SIZE
             + 2 * B * 2 * C.HIDDEN_SIZE * C.FLAT_OUT_SIZE
             + 2 * B * C.FLAT_OUT_SIZE * C.OUT_PAD)
    bytes_acc = (qix_col.size * 4 + img_flat.size * 4
                 + packed["wslab"].size * 2 + packed["bslab"].size * 4
                 + B * C.OUT_PAD * 4)

    return pl.pallas_call(
        functools.partial(fused_net_kernel, batch=B),
        out_shape=jax.ShapeDtypeStruct((B, C.OUT_PAD), jnp.float32),
        in_specs=[pl.BlockSpec(memory_space=pltpu.MemorySpace.VMEM)] * 4,
        out_specs=pl.BlockSpec(memory_space=pltpu.MemorySpace.VMEM),
        cost_estimate=pl.CostEstimate(
            flops=int(flops),
            transcendentals=int(B * (S + M) + 2 * B * C.OUT_PAD),
            bytes_accessed=int(bytes_acc)),
    )(qix_col, img_flat, packed["wslab"], packed["bslab"])


# ----------------------------- pure-JAX reference (f32) ----------------------
def reference_forward(p, img_feat, ques_ix):
    C = Cfg
    lang_mask = ques_ix == 0                                  # make_mask(ques_ix[...,None])
    img_mask = jnp.sum(jnp.abs(img_feat), axis=-1) == 0       # make_mask(img_feat)
    lang = p["embedding"][ques_ix]                            # embedding lookup
    lang = lang @ p["rnn_w"] + p["rnn_b"]                     # RNN stand-in (see TODO)
    img = img_feat @ p["img_w"] + p["img_b"]                  # img_feat_linear
    # Backbone: identity stub; gumbel hot vectors / last_hid are dead.

    def attflat(x, mask, s):
        h1 = jax.nn.relu(x @ p[f"af_{s}_w1"] + p[f"af_{s}_b1"])
        att = h1 @ p[f"af_{s}_w2"] + p[f"af_{s}_b2"]          # (B, n, 1)
        att = jnp.where(mask[..., None], -1.0e9, att)
        att = jax.nn.softmax(att, axis=1)
        x_atted = jnp.sum(att * x, axis=1)                    # G = 1
        return x_atted @ p[f"af_{s}_wm"] + p[f"af_{s}_bm"]

    x = attflat(lang, lang_mask, "lang") + attflat(img, img_mask, "img")
    mu = jnp.mean(x, axis=-1, keepdims=True)
    var = jnp.mean((x - mu) ** 2, axis=-1, keepdims=True)
    xn = (x - mu) / jnp.sqrt(var + C.LN_EPS) * p["ln_gamma"] + p["ln_beta"]
    return jax.nn.sigmoid(xn @ p["proj_w"] + p["proj_b"])


# ----------------------------- main ------------------------------------------
if __name__ == "__main__":
    C = Cfg
    root = jax.random.PRNGKey(0)
    k_param, k_img, k_ques = jax.random.split(root, 3)

    raw_params = init_params(k_param)
    packed = pack_params(raw_params)

    # deterministic inputs
    img_feat = jax.random.normal(
        k_img, (C.BATCH, C.REGIONS, C.IMG_FEAT_SIZE), jnp.float32)
    # zero out some regions so the image mask is non-trivial
    img_feat = img_feat.at[0, -3:, :].set(0.0)
    img_feat = img_feat.at[1, -1:, :].set(0.0)

    ques_ix = jax.random.randint(
        k_ques, (C.BATCH, C.SEQ), 1, C.TOKEN_SIZE, dtype=jnp.int32)
    # zero-pad the tail of each question so the language mask is non-trivial
    ques_ix = ques_ix.at[0, -2:].set(0)
    ques_ix = ques_ix.at[1, -3:].set(0)

    out_pad = jax.block_until_ready(net_search_forward(packed, img_feat, ques_ix))
    out = out_pad[:, :C.ANSWER_SIZE]
    ref = reference_forward(raw_params, img_feat, ques_ix)

    assert out_pad.shape == (C.BATCH, C.OUT_PAD)
    assert bool(jnp.all(jnp.isfinite(out_pad)))
    assert bool(jnp.all((out >= 0.0) & (out <= 1.0)))          # sigmoid output range
    # bf16 MXU operands + approx reciprocal vs. the f32 reference -> loose tolerance
    assert bool(jnp.allclose(out, ref, atol=3e-2)), \
        f"max |kernel - reference| = {float(jnp.max(jnp.abs(out - ref)))}"
    print("KERNEL_OK")
</pallas_src>

<mosaic_0001>
module attributes {stable_mosaic.version = 11 : i64} {
  func.func @fused_net_kernel(%arg0: memref<16x1xi32, #tpu.memory_space<vmem>>, %arg1: memref<32x64xf32, #tpu.memory_space<vmem>>, %arg2: memref<384x128xbf16, #tpu.memory_space<vmem>>, %arg3: memref<8x128xf32, #tpu.memory_space<vmem>>, %arg4: memref<2x128xf32, #tpu.memory_space<vmem>>) attributes {dimension_semantics = [], scalar_prefetch = 0 : i64, scratch_operands = 0 : i64, tpu.core_type = #tpu.core_type<tc>} {
    %c0 = arith.constant 0 : index
    %c0_0 = arith.constant 0 : index
    %0 = vector.load %arg2[%c0, %c0_0] : memref<384x128xbf16, #tpu.memory_space<vmem>>, vector<128x64xbf16>
    %c128 = arith.constant 128 : index
    %c0_1 = arith.constant 0 : index
    %1 = vector.load %arg2[%c128, %c0_1] : memref<384x128xbf16, #tpu.memory_space<vmem>>, vector<64x128xbf16>
    %c192 = arith.constant 192 : index
    %c0_2 = arith.constant 0 : index
    %2 = vector.load %arg2[%c192, %c0_2] : memref<384x128xbf16, #tpu.memory_space<vmem>>, vector<64x128xbf16>
    %c256 = arith.constant 256 : index
    %c0_3 = arith.constant 0 : index
    %3 = vector.load %arg2[%c256, %c0_3] : memref<384x128xbf16, #tpu.memory_space<vmem>>, vector<128x128xbf16>
    %c0_4 = arith.constant 0 : index
    %c0_5 = arith.constant 0 : index
    %4 = vector.load %arg3[%c0_4, %c0_5] : memref<8x128xf32, #tpu.memory_space<vmem>>, vector<8x128xf32>
    %5 = vector.extract_strided_slice %4 {offsets = [0, 0], sizes = [1, 128], strides = [1, 1]} : vector<8x128xf32> to vector<1x128xf32>
    %6 = vector.extract_strided_slice %4 {offsets = [1, 0], sizes = [1, 128], strides = [1, 1]} : vector<8x128xf32> to vector<1x128xf32>
    %7 = vector.extract_strided_slice %4 {offsets = [2, 0], sizes = [1, 128], strides = [1, 1]} : vector<8x128xf32> to vector<1x128xf32>
    %8 = vector.extract_strided_slice %4 {offsets = [3, 0], sizes = [1, 128], strides = [1, 1]} : vector<8x128xf32> to vector<1x128xf32>
    %9 = vector.extract_strided_slice %4 {offsets = [4, 0], sizes = [1, 128], strides = [1, 1]} : vector<8x128xf32> to vector<1x128xf32>
    %10 = vector.extract_strided_slice %4 {offsets = [5, 0], sizes = [1, 128], strides = [1, 1]} : vector<8x128xf32> to vector<1x128xf32>
    %11 = vector.extract_strided_slice %4 {offsets = [6, 0], sizes = [1, 128], strides = [1, 1]} : vector<8x128xf32> to vector<1x128xf32>
    %12 = vector.extract_strided_slice %4 {offsets = [7, 0], sizes = [1, 1], strides = [1, 1]} : vector<8x128xf32> to vector<1x1xf32>
    %13 = vector.extract_strided_slice %4 {offsets = [7, 1], sizes = [1, 1], strides = [1, 1]} : vector<8x128xf32> to vector<1x1xf32>
    %c0_6 = arith.constant 0 : index
    %c0_7 = arith.constant 0 : index
    %14 = vector.load %arg0[%c0_6, %c0_7] : memref<16x1xi32, #tpu.memory_space<vmem>>, vector<16x1xi32>
    %15 = tpu.iota {dimensions = array<i32: 1>} : vector<16x128xi32>
    %16 = vector.broadcast %14 : vector<16x1xi32> to vector<16x128xi32>
    %17 = arith.cmpi eq, %15, %16 : vector<16x128xi32>
    %18 = arith.extui %17 : vector<16x128xi1> to vector<16x128xi32>
    %19 = arith.sitofp %18 : vector<16x128xi32> to vector<16x128xf32>
    %c0_8 = arith.constant 0 : index
    %c0_9 = arith.constant 0 : index
    %20 = vector.load %arg1[%c0_8, %c0_9] : memref<32x64xf32, #tpu.memory_space<vmem>>, vector<32x64xf32>
    %cst = arith.constant 0.000000e+00 : f32
    %21 = vector.broadcast %cst : f32 to vector<32x64xf32>
    %22 = tpu.concatenate %21, %20 in 1 : vector<32x64xf32>, vector<32x64xf32> -> vector<32x128xf32>
    %23 = tpu.concatenate %19, %22 in 0 : vector<16x128xf32>, vector<32x128xf32> -> vector<48x128xf32>
    %24 = arith.truncf %23 : vector<48x128xf32> to vector<48x128xbf16>
    %cst_10 = arith.constant dense<0.000000e+00> : vector<48x64xf32>
    %25 = tpu.matmul %24, %0, %cst_10 {dimension_numbers = #tpu.dot_dimension_numbers<[1], [0], [0], [1], [0, 0, 1, 1], [], []>} : vector<48x128xbf16>, vector<128x64xbf16>, vector<48x64xf32> -> vector<48x64xf32>
    %26 = arith.truncf %25 : vector<48x64xf32> to vector<48x64xbf16>
    %cst_11 = arith.constant dense<0.000000e+00> : vector<48x128xf32>
    %27 = tpu.matmul %26, %1, %cst_11 {dimension_numbers = #tpu.dot_dimension_numbers<[1], [0], [0], [1], [0, 0, 1, 1], [], []>} : vector<48x64xbf16>, vector<64x128xbf16>, vector<48x128xf32> -> vector<48x128xf32>
    %28 = vector.broadcast %5 : vector<1x128xf32> to vector<48x128xf32>
    %29 = arith.addf %27, %28 : vector<48x128xf32>
    %cst_12 = arith.constant 0.000000e+00 : f32
    %30 = vector.broadcast %cst_12 : f32 to vector<48x128xf32>
    %31 = arith.maximumf %29, %30 : vector<48x128xf32>
    %32 = vector.extract_strided_slice %31 {offsets = [0, 0], sizes = [16, 128], strides = [1, 1]} : vector<48x128xf32> to vector<16x128xf32>
    %33 = vector.broadcast %6 : vector<1x128xf32> to vector<16x128xf32>
    %34 = arith.mulf %32, %33 : vector<16x128xf32>
    %cst_13 = arith.constant dense<0.000000e+00> : vector<16xf32>
    %35 = vector.multi_reduction <add>, %34, %cst_13 [1] : vector<16x128xf32> to vector<16xf32>
    %36 = vector.shape_cast %35 : vector<16xf32> to vector<16x1xf32>
    %37 = vector.broadcast %12 : vector<1x1xf32> to vector<16x1xf32>
    %38 = arith.addf %36, %37 : vector<16x1xf32>
    %c0_i32 = arith.constant 0 : i32
    %39 = vector.broadcast %c0_i32 : i32 to vector<16x1xi32>
    %40 = arith.cmpi eq, %14, %39 : vector<16x1xi32>
    %cst_14 = arith.constant -1.000000e+09 : f32
    %cst_15 = arith.constant 0.000000e+00 : f32
    %41 = vector.broadcast %cst_14 : f32 to vector<16x1xf32>
    %42 = vector.broadcast %cst_15 : f32 to vector<16x1xf32>
    %43 = arith.select %40, %41, %42 : vector<16x1xi1>, vector<16x1xf32>
    %44 = arith.addf %38, %43 : vector<16x1xf32>
    %45 = math.absf %20 : vector<32x64xf32>
    %cst_16 = arith.constant dense<0.000000e+00> : vector<32xf32>
    %46 = vector.multi_reduction <add>, %45, %cst_16 [1] : vector<32x64xf32> to vector<32xf32>
    %47 = vector.shape_cast %46 : vector<32xf32> to vector<32x1xf32>
    %cst_17 = arith.constant 0.000000e+00 : f32
    %48 = vector.broadcast %cst_17 : f32 to vector<32x1xf32>
    %49 = arith.cmpf oeq, %47, %48 : vector<32x1xf32>
    %50 = vector.extract_strided_slice %31 {offsets = [16, 0], sizes = [32, 128], strides = [1, 1]} : vector<48x128xf32> to vector<32x128xf32>
    %51 = vector.broadcast %7 : vector<1x128xf32> to vector<32x128xf32>
    %52 = arith.mulf %50, %51 : vector<32x128xf32>
    %cst_18 = arith.constant dense<0.000000e+00> : vector<32xf32>
    %53 = vector.multi_reduction <add>, %52, %cst_18 [1] : vector<32x128xf32> to vector<32xf32>
    %54 = vector.shape_cast %53 : vector<32xf32> to vector<32x1xf32>
    %55 = vector.broadcast %13 : vector<1x1xf32> to vector<32x1xf32>
    %56 = arith.addf %54, %55 : vector<32x1xf32>
    %cst_19 = arith.constant -1.000000e+09 : f32
    %cst_20 = arith.constant 0.000000e+00 : f32
    %57 = vector.broadcast %cst_19 : f32 to vector<32x1xf32>
    %58 = vector.broadcast %cst_20 : f32 to vector<32x1xf32>
    %59 = arith.select %49, %57, %58 : vector<32x1xi1>, vector<32x1xf32>
    %60 = arith.addf %56, %59 : vector<32x1xf32>
    %61 = vector.extract_strided_slice %25 {offsets = [0, 0], sizes = [16, 64], strides = [1, 1]} : vector<48x64xf32> to vector<16x64xf32>
    %62 = vector.shape_cast %44 : vector<16x1xf32> to vector<2x8x1xf32>
    %cst_21 = arith.constant dense<0xFF800000> : vector<2x1xf32>
    %63 = vector.multi_reduction <maximumf>, %62, %cst_21 [1] : vector<2x8x1xf32> to vector<2x1xf32>
    %64 = vector.shape_cast %63 : vector<2x1xf32> to vector<2x1x1xf32>
    %65 = vector.broadcast %64 : vector<2x1x1xf32> to vector<2x8x1xf32>
    %66 = arith.subf %62, %65 : vector<2x8x1xf32>
    %67 = math.exp %66 : vector<2x8x1xf32>
    %cst_22 = arith.constant dense<0.000000e+00> : vector<2x1xf32>
    %68 = vector.multi_reduction <add>, %67, %cst_22 [1] : vector<2x8x1xf32> to vector<2x1xf32>
    %69 = vector.shape_cast %68 : vector<2x1xf32> to vector<2x1x1xf32>
    %70 = tpu.reciprocal %69 {approx = true} : vector<2x1x1xf32> -> vector<2x1x1xf32>
    %71 = vector.broadcast %70 : vector<2x1x1xf32> to vector<2x8x1xf32>
    %72 = arith.mulf %67, %71 : vector<2x8x1xf32>
    %73 = vector.shape_cast %61 : vector<16x64xf32> to vector<2x8x64xf32>
    %74 = vector.broadcast %72 : vector<2x8x1xf32> to vector<2x8x64xf32>
    %75 = arith.mulf %74, %73 : vector<2x8x64xf32>
    %cst_23 = arith.constant dense<0.000000e+00> : vector<2x64xf32>
    %76 = vector.multi_reduction <add>, %75, %cst_23 [1] : vector<2x8x64xf32> to vector<2x64xf32>
    %77 = vector.extract_strided_slice %25 {offsets = [16, 0], sizes = [32, 64], strides = [1, 1]} : vector<48x64xf32> to vector<32x64xf32>
    %78 = vector.shape_cast %60 : vector<32x1xf32> to vector<2x16x1xf32>
    %cst_24 = arith.constant dense<0xFF800000> : vector<2x1xf32>
    %79 = vector.multi_reduction <maximumf>, %78, %cst_24 [1] : vector<2x16x1xf32> to vector<2x1xf32>
    %80 = vector.shape_cast %79 : vector<2x1xf32> to vector<2x1x1xf32>
    %81 = vector.broadcast %80 : vector<2x1x1xf32> to vector<2x16x1xf32>
    %82 = arith.subf %78, %81 : vector<2x16x1xf32>
    %83 = math.exp %82 : vector<2x16x1xf32>
    %cst_25 = arith.constant dense<0.000000e+00> : vector<2x1xf32>
    %84 = vector.multi_reduction <add>, %83, %cst_25 [1] : vector<2x16x1xf32> to vector<2x1xf32>
    %85 = vector.shape_cast %84 : vector<2x1xf32> to vector<2x1x1xf32>
    %86 = tpu.reciprocal %85 {approx = true} : vector<2x1x1xf32> -> vector<2x1x1xf32>
    %87 = vector.broadcast %86 : vector<2x1x1xf32> to vector<2x16x1xf32>
    %88 = arith.mulf %83, %87 : vector<2x16x1xf32>
    %89 = vector.shape_cast %77 : vector<32x64xf32> to vector<2x16x64xf32>
    %90 = vector.broadcast %88 : vector<2x16x1xf32> to vector<2x16x64xf32>
    %91 = arith.mulf %90, %89 : vector<2x16x64xf32>
    %cst_26 = arith.constant dense<0.000000e+00> : vector<2x64xf32>
    %92 = vector.multi_reduction <add>, %91, %cst_26 [1] : vector<2x16x64xf32> to vector<2x64xf32>
    %93 = arith.addf %76, %92 : vector<2x64xf32>
    %94 = arith.truncf %93 : vector<2x64xf32> to vector<2x64xbf16>
    %cst_27 = arith.constant dense<0.000000e+00> : vector<2x128xf32>
    %95 = tpu.matmul %94, %2, %cst_27 {dimension_numbers = #tpu.dot_dimension_numbers<[1], [0], [0], [1], [0, 0, 1, 1], [], []>} : vector<2x64xbf16>, vector<64x128xbf16>, vector<2x128xf32> -> vector<2x128xf32>
    %96 = vector.broadcast %8 : vector<1x128xf32> to vector<2x128xf32>
    %97 = arith.addf %95, %96 : vector<2x128xf32>
    %cst_28 = arith.constant dense<0.000000e+00> : vector<2xf32>
    %98 = vector.multi_reduction <add>, %97, %cst_28 [1] : vector<2x128xf32> to vector<2xf32>
    %99 = vector.shape_cast %98 : vector<2xf32> to vector<2x1xf32>
    %cst_29 = arith.constant 1.280000e+02 : f32
    %100 = vector.broadcast %cst_29 : f32 to vector<2x1xf32>
    %101 = arith.divf %99, %100 : vector<2x1xf32>
    %102 = vector.broadcast %101 : vector<2x1xf32> to vector<2x128xf32>
    %103 = arith.subf %97, %102 : vector<2x128xf32>
    %104 = arith.mulf %103, %103 : vector<2x128xf32>
    %cst_30 = arith.constant dense<0.000000e+00> : vector<2xf32>
    %105 = vector.multi_reduction <add>, %104, %cst_30 [1] : vector<2x128xf32> to vector<2xf32>
    %106 = vector.shape_cast %105 : vector<2xf32> to vector<2x1xf32>
    %cst_31 = arith.constant 1.280000e+02 : f32
    %107 = vector.broadcast %cst_31 : f32 to vector<2x1xf32>
    %108 = arith.divf %106, %107 : vector<2x1xf32>
    %109 = vector.broadcast %101 : vector<2x1xf32> to vector<2x128xf32>
    %110 = arith.subf %97, %109 : vector<2x128xf32>
    %cst_32 = arith.constant 9.99999974E-6 : f32
    %111 = vector.broadcast %cst_32 : f32 to vector<2x1xf32>
    %112 = arith.addf %108, %111 : vector<2x1xf32>
    %113 = math.rsqrt %112 : vector<2x1xf32>
    %114 = vector.broadcast %113 : vector<2x1xf32> to vector<2x128xf32>
    %115 = arith.mulf %110, %114 : vector<2x128xf32>
    %116 = vector.broadcast %9 : vector<1x128xf32> to vector<2x128xf32>
    %117 = arith.mulf %115, %116 : vector<2x128xf32>
    %118 = vector.broadcast %10 : vector<1x128xf32> to vector<2x128xf32>
    %119 = arith.addf %117, %118 : vector<2x128xf32>
    %120 = arith.truncf %119 : vector<2x128xf32> to vector<2x128xbf16>
    %cst_33 = arith.constant dense<0.000000e+00> : vector<2x128xf32>
    %121 = tpu.matmul %120, %3, %cst_33 {dimension_numbers = #tpu.dot_dimension_numbers<[1], [0], [0], [1], [0, 0, 1, 1], [], []>} : vector<2x128xbf16>, vector<128x128xbf16>, vector<2x128xf32> -> vector<2x128xf32>
    %122 = vector.broadcast %11 : vector<1x128xf32> to vector<2x128xf32>
    %123 = arith.addf %121, %122 : vector<2x128xf32>
    %124 = arith.negf %123 : vector<2x128xf32>
    %125 = math.exp %124 : vector<2x128xf32>
    %cst_34 = arith.constant 1.000000e+00 : f32
    %126 = vector.broadcast %cst_34 : f32 to vector<2x128xf32>
    %127 = arith.addf %126, %125 : vector<2x128xf32>
    %128 = arith.divf %126, %127 : vector<2x128xf32>
    %c0_35 = arith.constant 0 : index
    %c0_36 = arith.constant 0 : index
    %129 = vector.load %arg4[%c0_35, %c0_36] : memref<2x128xf32, #tpu.memory_space<vmem>>, vector<2x128xf32>
    tpu.vector_store %arg4[%c0_35, %c0_36], %128 {strides = array<i32>} : memref<2x128xf32, #tpu.memory_space<vmem>>, vector<2x128xf32>,
    return
  }
}

</mosaic_0001>

<bundles_post_ra>
// kernel: net_search_forward.1
= control target key start
LH: loop header
LB: loop body
LE: loop exit
PB: predicated region body
PF: predicated region fallthrough
CT: control target
= control target key end

     0   :  { %9 = vsyncpa [#allocation3], 0  ;;  %s1308_s0 = inlined_call_operand.vmem [shape: s32[16,1], index: 0, kind: input, shape index: {}]   ;;  %s1309_s1 = inlined_call_operand.hbm [shape: f32[32,64], index: 1, kind: input, shape index: {}]   ;;  %s1310_s2 = inlined_call_operand.hbm [shape: bf16[384,128], index: 2, kind: input, shape index: {}]   ;;  %s1311_s3 = inlined_call_operand.vmem [shape: f32[8,128], index: 3, kind: input, shape index: {}]   ;;  %s1312_s4 = inlined_call_operand.hbm [shape: f32[2,128], index: 4, kind: output, shape index: {}]  }
   0x1   :  { %10 = vsyncpa [#allocation6], 0 }
   0x2   :  { %11 = vsyncpa [#allocation4], 0  ;;  %s1102_s15 = smov [#allocation2]  }
   0x3   :  { %s19_s16 = sshll.u32 %s1102_s15, 4  ;;  %s20_s16 = int_to_ptr.vmem [resolvable:$true] %s19_s16 }
   0x4   :  { %s1044_s17 = scalar_lea.vmem %s20_s16, 512  ;;  %p1049_p1 = scmp.lt.s32.totalorder %s20_s16, %s20_s16 }
   0x5   :  { %p1045_p0 = scmp.ne.s32.totalorder %s20_s16, %s1044_s17  ;;  %p1050_p2 = scmp.lt.s32.totalorder %s1044_s17, %s1044_s17 }
   0x7   :  { %p1051_p3 = por %p1050_p2, %p1049_p1 }
   0x9   :  { %p1052_p4 = pnand %p1051_p3, %p1045_p0 }
   0xb   :  { %1055 = shalt.err (!%p1052_p4)
}
   0xc   :  { %s1103_s18 = smov 128   ;;  %s1104_s19 = smov 8  }
   0xd   :  { %25 = dma.hbm_to_vmem [thread:$0]  %s1309_s1, 512, %s20_s16, [#allocation3], %s1103_s18, %s1103_s18, %s1104_s19  }
   0xe   :  { %s1105_s22 = smov [#allocation5]  }
   0xf   :  { %s31_s23 = sshll.u32 %s1105_s22, 4  ;;  %s32_s23 = int_to_ptr.vmem [resolvable:$true] %s31_s23 }
  0x10   :  { %s1064_s24 = scalar_lea.vmem %s32_s23, 3072  ;;  %p1069_p6 = scmp.lt.s32.totalorder %s32_s23, %s32_s23 }
  0x11   :  { %p1065_p5 = scmp.ne.s32.totalorder %s32_s23, %s1064_s24  ;;  %p1070_p7 = scmp.lt.s32.totalorder %s1064_s24, %s1064_s24 }
  0x13   :  { %p1071_p8 = por %p1070_p7, %p1069_p6 }
  0x15   :  { %p1072_p9 = pnand %p1071_p8, %p1065_p5 }
  0x17   :  { %1075 = shalt.err (!%p1072_p9)
}
  0x18   :  { %s1106_s25 = smov 64   ;;  %s1107_s26 = smov 4  }
  0x19   :  { %37 = dma.hbm_to_vmem [thread:$0]  %s1310_s2, 3072, %s32_s23, [#allocation6], %s1106_s25, %s1106_s25, %s1107_s26  }
  0x1a   :  { %1096 = dma.done.wait [#allocation3], 512  }
  0x1b   :  { %1097 = vsyncadd [#allocation3], 4294966784 }
  0x1c   :  { %1098 = dma.done.wait [#allocation6], 3072  }
  0x1d   :  { %1099 = vsyncadd [#allocation6], 4294964224  ;;  %v1108_v0 = vmov 0   ;;  %v1109_v1 = vmov 0.0   ;;  %v1151_v2 = vld [vmem:[%s1308_s0] sm:$0xff]  ;;  %v1156_v4 = vld [vmem:[#allocation2 + $0x8] sm:$0xff]  ;;  %v98_v20 = vlaneseq }
  0x1e   :  { %970 = vset.pattern.permute.xlu0 %v1108_v0  ;;  %878 = vmatprep.subr.bf16.mxu0 %v1109_v1  ;;  %v1153_v3 = vld [vmem:[#allocation2] sm:$0xff]  ;;  %v1158_v5 = vld [vmem:[#allocation2 + $0x10] sm:$0xff]  ;;  %v1163_v6 = vld [vmem:[%s1308_s0 + $0x8] sm:$0xff]  ;;  %vm1110_vm0 = vmmov 0   ;;  %vm132_vm4 = vcmask 523264   ;;  %vm483_vm9 = vcmask 15368  }
  0x1f   :  { %906 = vmatprep.subr.bf16.mxu1 %v1109_v1  ;;  %101 = vperm.xlu0 %970, %v1151_v2   ;;  %v971_v7 = vpack.i.bf16 %v1156_v4, %v1153_v3  ;;  %v1167_v8 = vld [vmem:[#allocation2 + $0x18] sm:$0xff]  ;;  %v987_v11 = vld [vmem:[#allocation5 + $0x30] sm:$0xff]   ;;  %v988_v12 = vld [vmem:[#allocation5 + $0x28] sm:$0xff]   ;;  %v99_v22 = vand.u32 127, %v98_v20  ;;  %v1111_v25 = vmov 1.0|1.0  }
  0x20   :  { %v986_v9 = vld [vmem:[#allocation5 + $0x38] sm:$0xff]   ;;  %v976_v10 = vpack.i.bf16 %v1167_v8, %v1158_v5  ;;  %894 = vmatprep.mubr.msk.bf16.mxu0 %vm1110_vm0, %v1109_v1  ;;  %914 = vmatprep.mubr.msk.bf16.mxu1 %vm1110_vm0, %v1109_v1  ;;  %v989_v13 = vld [vmem:[#allocation5 + $0x20] sm:$0xff]   ;;  %v991_v15 = vld [vmem:[#allocation5 + $0x10] sm:$0xff]   ;;  %v370_v50 = vand.u32 2147483647, %v1153_v3  ;;  %v1232_v58 = vshrl.u32 %v98_v20, 7 }
  0x21   :  { %972 = vrot.lane.b32.xlu1 %v971_v7, %s1106_s25  ;;  %879 = vmatpush3.bf16.msra.mxu0 %v986_v9  ;;  %v990_v14 = vld [vmem:[#allocation5 + $0x18] sm:$0xff]   ;;  %v995_v17 = vld [vmem:[#allocation5 + $0x50] sm:$0xff]   ;;  %v992_v18 = vld [vmem:[#allocation5 + $0x8] sm:$0xff]   ;;  %v371_v51 = vand.u32 2147483647, %v1156_v4  ;;  %vm364_vm10 = vcmp.eq.s32.totalorder %v1151_v2, 0 }
  0x22   :  { %880 = vmatprep.subr.bf16.mxu0 %v1109_v1  ;;  %v994_v16 = vld [vmem:[#allocation5 + $0x58] sm:$0xff]   ;;  %v993_v19 = vld [vmem:[#allocation5] sm:$0xff]   ;;  %vm815_vm5 = vmneg %vm132_vm4  ;;  %v374_v52 = vsel %vm132_vm4, %v370_v50, 0.0  ;;  %v372_v53 = vand.u32 2147483647, %v1158_v5  ;;  %v250_v61 = vsub.s32 0, %v1232_v58 }
  0x23   :  { %104 = vperm.xlu0 %970, %v1163_v6   ;;  %907 = vmatpush3.bf16.msra.mxu1 %v994_v16  ;;  %vm817_vm6 = vmpackc.low %vm815_vm5, %vm815_vm5  ;;  %v996_v33 = vld [vmem:[#allocation5 + $0x48] sm:$0xff]   ;;  %v997_v34 = vld [vmem:[#allocation5 + $0x40] sm:$0xff]   ;;  %v377_v54 = vsel %vm132_vm4, %v371_v51, 0.0  ;;  %v373_v56 = vand.u32 2147483647, %v1167_v8  ;;  %v392_v3 = vsub.s32 2, %v1232_v58 }
  0x24   :  { %908 = vmatprep.subr.bf16.mxu1 %v1109_v1  ;;  %v380_v55 = vsel %vm132_vm4, %v372_v53, 0.0  ;;  %v1238_v62 = vld [vmem:[%s1311_s3] sm:$0xff]  ;;  %vm365_vm13 = vcmp.eq.s32.totalorder %v1163_v6, 0  ;;  %vm418_vm14 = vcmask 7168   ;;  %vm592_vm15 = vcmask 1041409   ;;  %s1113_s3 = smov [#allocation7]  }
  0x25   :  { %977 = vrot.lane.b32.xlu1 %v976_v10, %s1106_s25  ;;  %881 = vmatpush3.bf16.msra.mxu0 %v987_v11  ;;  %v383_v57 = vsel %vm132_vm4, %v373_v56, 0.0  ;;  %v251_v5 = vrot.slane %v1238_v62, %v250_v61  ;;  %v393_v9 = vrot.slane %v1238_v62, %v392_v3  ;;  %v366_v3 = vsel %vm364_vm10, -1e+09, %v1109_v1  ;;  %s793_s6 = sshll.u32 %s1113_s3, 4  ;;  %s794_s6 = int_to_ptr.vmem [resolvable:$true] %s793_s6 }
  0x26   :  { %882 = vmatprep.subr.bf16.mxu0 %v1109_v1  ;;  %s1076_s7 = scalar_lea.vmem %s794_s6, 32  ;;  %p1081_p11 = scmp.lt.s32.totalorder %s794_s6, %s794_s6 }
  0x27   :  { %909 = vmatpush3.bf16.msra.mxu1 %v995_v17  ;;  %p1077_p10 = scmp.ne.s32.totalorder %s794_s6, %s1076_s7  ;;  %p1082_p12 = scmp.lt.s32.totalorder %s1076_s7, %s1076_s7 }
  0x28   :  { %910 = vmatprep.subr.bf16.mxu1 %v1109_v1 }
  0x29   :  { %883 = vmatpush3.bf16.msra.mxu0 %v988_v12  ;;  %p1083_p13 = por %p1082_p12, %p1081_p11 }
  0x2a   :  { %884 = vmatprep.subr.bf16.mxu0 %v1109_v1 }
  0x2b   :  { %911 = vmatpush3.bf16.msra.mxu1 %v996_v33  ;;  %p1084_p0 = pnand %p1083_p13, %p1077_p10 }
  0x2c   :  { %912 = vmatprep.subr.bf16.mxu1 %v1109_v1 }
  0x2d   :  { %885 = vmatpush3.bf16.msra.mxu0 %v989_v13 }
  0x2e   :  { %886 = vmatprep.subr.bf16.mxu0 %v1109_v1 }
  0x2f   :  { %913 = vmatpush3.bf16.msra.mxu1 %v997_v34 }
  0x30   :  { %926 = vmatprep.subr.bf16.mxu1 %v1109_v1 }
  0x31   :  { %887 = vmatpush3.bf16.msra.mxu0 %v990_v14 }
  0x32   :  { %888 = vmatprep.subr.bf16.mxu0 %v1109_v1 }
  0x35   :  { %889 = vmatpush3.bf16.msra.mxu0 %v991_v15 }
  0x36   :  { %890 = vmatprep.subr.bf16.mxu0 %v1109_v1 }
  0x39   :  { %891 = vmatpush3.bf16.msra.mxu0 %v992_v18  ;;  %v350_v18 = vsub.s32 1, %v1232_v58 }
  0x3a   :  { %892 = vmatprep.subr.bf16.mxu0 %v1109_v1 }
  0x3d   :  { %893 = vmatpush3.bf16.msra.mxu0 %v993_v19 }
  0x3e   :  { %938 = vmatprep.subr.bf16.mxu0 %v1109_v1 }
  0x42   :  { %375 = vadd.xlane.f32.xlu0 %v374_v52 }
  0x46   :  { %381 = vadd.xlane.f32.xlu0 %v380_v55 }
  0x49   :  { %378 = vadd.xlane.f32.xlu1 %v377_v54 }
  0x4a   :  { %384 = vadd.xlane.f32.xlu0 %v383_v57 }
  0x93   :  { %v973_v24 = vpop.permute.xlu1 %972 }
  0x94   :  { %v975_v26 = vunpack.i.h.bf16 %v973_v24  ;;  %v974_v27 = vunpack.i.l.bf16 %v973_v24 }
  0x96   :  { %v818_v28 = vpack.c.bf16 %v975_v26, %v974_v27 }
  0x97   :  { %v978_v29 = vpop.permute.xlu1 %977 }
  0x98   :  { %v980_v30 = vunpack.i.h.bf16 %v978_v29  ;;  %v979_v31 = vunpack.i.l.bf16 %v978_v29 }
  0x9a   :  { %v102_v21 = vpop.permute.xlu0 %101  ;;  %v823_v32 = vpack.c.bf16 %v980_v30, %v979_v31 }
  0x9b   :  { %vm106_vm1 = vcmp.eq.s32.totalorder %v99_v22, %v102_v21 }
  0x9e   :  { %v105_v23 = vpop.permute.xlu0 %104 }
  0x9f   :  { %vm107_vm2 = vcmp.eq.s32.totalorder %v99_v22, %v105_v23 }
  0xa0   :  { %vm813_vm3 = vmpackc.low %vm107_vm2, %vm106_vm1 }
  0xa1   :  { %895 = vmatmul.mubr.msk.bf16.vlgmr.msra.gmra.mxu0 %vm813_vm3, %v1111_v25  ;;  %v351_v25 = vrot.slane %v1238_v62, %v350_v18 }
  0xa2   :  { %898 = vmatprep.mubr.msk.bf16.mxu0 %vm1110_vm0, %v1109_v1 }
  0xa9   :  { %899 = vmatmul.mubr.msk.bf16.gmra.mxu0 %vm817_vm6, %v818_v28 }
  0xaa   :  { %902 = vmatprep.mubr.msk.bf16.mxu0 %vm1110_vm0, %v1109_v1 }
  0xb1   :  { %903 = vmatmul.mubr.msk.bf16.gmra.mxu0 %vm817_vm6, %v823_v32 }
  0xb2   :  { %954 = vmatprep.mubr.msk.bf16.mxu0 %vm1110_vm0, %v1109_v1 }
 0x161   :  { %v1196_v35 = vpop.f32.mrf.mxu0 }
 0x163   :  { %v896_v36 = vpop.f32.mrf.mxu0 }
 0x165   :  { %v1198_v37 = vpop.f32.mrf.mxu0 }
 0x166   :  { %v245_v38 = vpack.c.bf16 %v1198_v37, %v1196_v35 }
 0x167   :  { %v897_v39 = vpop.f32.mrf.mxu0 }
 0x168   :  { %915 = vmatmul.mubr.msk.bf16.vlgmr.msra.gmra.mxu1 %vm132_vm4, %v245_v38  ;;  %v1112_v38 = vmov 1   ;;  %v376_v39 = vpop.xlane.xlu0 %375 }
 0x169   :  { %v1203_v40 = vpop.f32.mrf.mxu0  ;;  %918 = vmatprep.mubr.msk.bf16.mxu1 %vm1110_vm0, %v1109_v1  ;;  %981 = vset.pattern.permute.xlu1 %v1112_v38  ;;  %vm386_vm7 = vcmp.eq.f32.partialorder %v376_v39, 0.0 }
 0x16a   :  { %982 = vset.pattern.permute.xlu0 %v1112_v38  ;;  %v410_v51 = vsel %vm386_vm7, -1e+09, %v1109_v1 }
 0x16b   :  { %v900_v41 = vpop.f32.mrf.mxu0 }
 0x16c   :  { %v382_v41 = vpop.xlane.xlu0 %381 }
 0x16d   :  { %v1207_v42 = vpop.f32.mrf.mxu0  ;;  %vm388_vm11 = vcmp.eq.f32.partialorder %v382_v41, 0.0 }
 0x16e   :  { %v246_v43 = vpack.c.bf16 %v1207_v42, %v1203_v40 }
 0x16f   :  { %v901_v44 = vpop.f32.mrf.mxu0 }
 0x170   :  { %919 = vmatmul.mubr.msk.bf16.gmra.mxu1 %vm132_vm4, %v246_v43  ;;  %v360_v43 = vsub.s32 7, %v1232_v58  ;;  %v379_v44 = vpop.xlane.xlu1 %378 }
 0x171   :  { %v1212_v45 = vpop.f32.mrf.mxu0  ;;  %922 = vmatprep.mubr.msk.bf16.mxu1 %vm1110_vm0, %v1109_v1  ;;  %vm387_vm8 = vcmp.eq.f32.partialorder %v379_v44, 0.0 }
 0x172   :  { %v411_v55 = vsel %vm387_vm8, -1e+09, %v1109_v1 }
 0x173   :  { %v904_v46 = vpop.f32.mrf.mxu0 }
 0x174   :  { %v361_v46 = vrot.slane %v1238_v62, %v360_v43 }
 0x175   :  { %v1216_v47 = vpop.f32.mrf.mxu0 }
 0x176   :  { %v247_v48 = vpack.c.bf16 %v1216_v47, %v1212_v45 }
 0x177   :  { %v905_v49 = vpop.f32.mrf.mxu0 }
 0x178   :  { %923 = vmatmul.mubr.msk.bf16.gmra.mxu1 %vm132_vm4, %v247_v48  ;;  %v385_v48 = vpop.xlane.xlu0 %384 }
 0x179   :  { %934 = vmatprep.mubr.msk.bf16.mxu1 %vm1110_vm0, %v1109_v1  ;;  %vm389_vm12 = vcmp.eq.f32.partialorder %v385_v48, 0.0  ;;  %vm662_vm0 = vcmask 1041408  }
 0x228   :  { %v319_v59 = vpop.f32.mrf.mxu1 }
 0x229   :  { %v320_v19 = vadd.f32 %v319_v59, %v251_v5 }
 0x22a   :  { %v916_v60 = vpop.f32.mrf.mxu1 }
 0x22b   :  { %v342_v26 = vmax.f32 %v320_v19, 0.0 }
 0x22c   :  { %v322_v63 = vpop.f32.mrf.mxu1 }
 0x22d   :  { %v323_v27 = vadd.f32 %v322_v63, %v251_v5  ;;  %v352_v33 = vmul.f32 %v351_v25, %v342_v26 }
 0x22e   :  { %v917_v4 = vpop.f32.mrf.mxu1 }
 0x22f   :  { %v343_v32 = vmax.f32 %v323_v27, 0.0  ;;  %v412_v4 = vsel %vm388_vm11, -1e+09, %v1109_v1 }
 0x230   :  { %v327_v7 = vpop.f32.mrf.mxu1 }
 0x231   :  { %v328_v8 = vadd.f32 %v327_v7, %v251_v5  ;;  %v353_v36 = vmul.f32 %v351_v25, %v343_v32 }
 0x232   :  { %v920_v10 = vpop.f32.mrf.mxu1 }
 0x233   :  { %v344_v11 = vmax.f32 %v328_v8, 0.0 }
 0x234   :  { %v330_v12 = vpop.f32.mrf.mxu1 }
 0x235   :  { %v331_v13 = vadd.f32 %v330_v12, %v251_v5  ;;  %v394_v14 = vmul.f32 %v393_v9, %v344_v11  ;;  %v413_v11 = vsel %vm389_vm12, -1e+09, %v1109_v1 }
 0x236   :  { %v921_v15 = vpop.f32.mrf.mxu1 }
 0x237   :  { %v345_v16 = vmax.f32 %v331_v13, 0.0  ;;  %398 = vadd.xlane.f32.xlu1 %v394_v14 }
 0x238   :  { %v335_v17 = vpop.f32.mrf.mxu1 }
 0x239   :  { %v336_v20 = vadd.f32 %v335_v17, %v251_v5  ;;  %v395_v21 = vmul.f32 %v393_v9, %v345_v16  ;;  %v367_v16 = vsel %vm365_vm13, -1e+09, %v1109_v1 }
 0x23a   :  { %v924_v22 = vpop.f32.mrf.mxu1 }
 0x23b   :  { %v346_v23 = vmax.f32 %v336_v20, 0.0  ;;  %400 = vadd.xlane.f32.xlu0 %v395_v21 }
 0x23c   :  { %v338_v24 = vpop.f32.mrf.mxu1 }
 0x23d   :  { %v339_v28 = vadd.f32 %v338_v24, %v251_v5  ;;  %v396_v29 = vmul.f32 %v393_v9, %v346_v23 }
 0x23e   :  { %v925_v30 = vpop.f32.mrf.mxu1 }
 0x23f   :  { %v347_v31 = vmax.f32 %v339_v28, 0.0  ;;  %402 = vadd.xlane.f32.xlu1 %v396_v29 }
 0x241   :  { %v397_v34 = vmul.f32 %v393_v9, %v347_v31 }
 0x243   :  { %354 = vadd.xlane.f32.xlu1 %v352_v33  ;;  %404 = vadd.xlane.f32.xlu0 %v397_v34 }
 0x247   :  { %356 = vadd.xlane.f32.xlu0 %v353_v36 }
 0x2c0   :  { %v399_v49 = vpop.xlane.xlu1 %398 }
 0x2c1   :  { %v406_v50 = vadd.f32 %v399_v49, %v361_v46 }
 0x2c3   :  { %v414_v53 = vadd.f32 %v410_v51, %v406_v50 }
 0x2c4   :  { %v401_v52 = vpop.xlane.xlu0 %400 }
 0x2c5   :  { %v407_v54 = vadd.f32 %v401_v52, %v361_v46  ;;  %v484_v59 = vsel %vm483_vm9, %v414_v53, -inf }
 0x2c7   :  { %v415_v56 = vadd.f32 %v411_v55, %v407_v54 }
 0x2c8   :  { %v403_v57 = vpop.xlane.xlu1 %402 }
 0x2c9   :  { %v485_v60 = vsel %vm483_vm9, %v415_v56, -inf  ;;  %v408_v61 = vadd.f32 %v403_v57, %v361_v46 }
 0x2ca   :  { %v486_v63 = vmax.f32 %v484_v59, %v485_v60 }
 0x2cb   :  { %v416_v9 = vadd.f32 %v412_v4, %v408_v61 }
 0x2cc   :  { %v487_v5 = vrot.slane %v486_v63, 4  ;;  %v355_v7 = vpop.xlane.xlu1 %354  ;;  %v405_v8 = vpop.xlane.xlu0 %404 }
 0x2cd   :  { %v362_v2 = vadd.f32 %v361_v46, %v355_v7  ;;  %v409_v10 = vadd.f32 %v405_v8, %v361_v46  ;;  %v493_v18 = vsel %vm483_vm9, %v416_v9, -inf }
 0x2ce   :  { %v488_v12 = vmax.f32 %v486_v63, %v487_v5 }
 0x2cf   :  { %v368_v13 = vadd.f32 %v366_v3, %v362_v2  ;;  %v417_v14 = vadd.f32 %v413_v11, %v409_v10 }
 0x2d0   :  { %v489_v15 = vrot.slane %v488_v12, 2  ;;  %v357_v17 = vpop.xlane.xlu0 %356 }
 0x2d1   :  { %v419_v19 = vsel %vm418_vm14, %v368_v13, -inf  ;;  %v494_v20 = vsel %vm483_vm9, %v417_v14, -inf  ;;  %v363_v6 = vadd.f32 %v361_v46, %v357_v17 }
 0x2d2   :  { %v490_v21 = vmax.f32 %v488_v12, %v489_v15  ;;  %v420_v22 = vrot.slane %v419_v19, 4  ;;  %v495_v23 = vmax.f32 %v493_v18, %v494_v20 }
 0x2d3   :  { %v369_v24 = vadd.f32 %v367_v16, %v363_v6 }
 0x2d4   :  { %v491_v25 = vrot.slane %v490_v21, 1  ;;  %v421_v26 = vmax.f32 %v419_v19, %v420_v22  ;;  %v496_v27 = vrot.slane %v495_v23, 4 }
 0x2d5   :  { %v426_v28 = vsel %vm418_vm14, %v369_v24, -inf }
 0x2d6   :  { %v492_v29 = vmax.f32 %v490_v21, %v491_v25  ;;  %v422_v30 = vrot.slane %v421_v26, 2  ;;  %v497_v31 = vmax.f32 %v495_v23, %v496_v27  ;;  %v427_v32 = vrot.slane %v426_v28, 4 }
 0x2d8   :  { %v502_v33 = vsub.f32 %v414_v53, %v492_v29  ;;  %v503_v34 = vsub.f32 %v415_v56, %v492_v29  ;;  %v423_v36 = vmax.f32 %v421_v26, %v422_v30  ;;  %v498_v39 = vrot.slane %v497_v31, 2 }
 0x2d9   :  { %v428_v41 = vmax.f32 %v426_v28, %v427_v32 }
 0x2da   :  { %v506_v43 = vmul.f32 1.442695, %v502_v33  ;;  %v508_v44 = vmul.f32 1.442695, %v503_v34  ;;  %v424_v46 = vrot.slane %v423_v36, 1  ;;  %v499_v48 = vmax.f32 %v497_v31, %v498_v39 }
 0x2db   :  { %v429_v49 = vrot.slane %v428_v41, 2 }
 0x2dc   :  { %1010 = vpow2.f32 %v506_v43  ;;  %v425_v50 = vmax.f32 %v423_v36, %v424_v46  ;;  %v500_v51 = vrot.slane %v499_v48, 1 }
 0x2dd   :  { %1012 = vpow2.f32 %v508_v44  ;;  %v430_v52 = vmax.f32 %v428_v41, %v429_v49 }
 0x2de   :  { %v433_v54 = vsub.f32 %v368_v13, %v425_v50  ;;  %v501_v55 = vmax.f32 %v499_v48, %v500_v51 }
 0x2df   :  { %v431_v57 = vrot.slane %v430_v52, 1 }
 0x2e0   :  { %v435_v59 = vmul.f32 1.442695, %v433_v54  ;;  %v504_v60 = vsub.f32 %v416_v9, %v501_v55  ;;  %v505_v53 = vsub.f32 %v417_v14, %v501_v55 }
 0x2e1   :  { %v432_v56 = vmax.f32 %v430_v52, %v431_v57 }
 0x2e2   :  { %1014 = vpow2.f32 %v435_v59  ;;  %v510_v61 = vmul.f32 1.442695, %v504_v60  ;;  %v512_v63 = vmul.f32 1.442695, %v505_v53 }
 0x2e3   :  { %v434_v3 = vsub.f32 %v369_v24, %v432_v56  ;;  %v998_v56 = vld [vmem:[#allocation5 + $0x78] sm:$0xff]  }
 0x2e4   :  { %1016 = vpow2.f32 %v510_v61  ;;  %927 = vmatpush3.bf16.msra.mxu1 %v998_v56  ;;  %v999_v61 = vld [vmem:[#allocation5 + $0x70] sm:$0xff]  }
 0x2e5   :  { %1018 = vpow2.f32 %v512_v63  ;;  %v437_v4 = vmul.f32 1.442695, %v434_v3  ;;  %928 = vmatprep.subr.bf16.mxu1 %v1109_v1  ;;  %v1000_v63 = vld [vmem:[#allocation5 + $0x68] sm:$0xff]  }
 0x2e7   :  { %1020 = vpow2.f32 %v437_v4 }
 0x2e8   :  { %929 = vmatpush3.bf16.msra.mxu1 %v999_v61 }
 0x2e9   :  { %v1011_v5 = vpop.eup %1010  ;;  %930 = vmatprep.subr.bf16.mxu1 %v1109_v1 }
 0x2ea   :  { %v1013_v7 = vpop.eup %1012  ;;  %v514_v8 = vsel %vm483_vm9, %v1011_v5, 0.0 }
 0x2eb   :  { %v515_v2 = vsel %vm483_vm9, %v1013_v7, 0.0 }
 0x2ec   :  { %v516_v10 = vadd.f32 %v515_v2, %v514_v8  ;;  %931 = vmatpush3.bf16.msra.mxu1 %v1000_v63 }
 0x2ed   :  { %932 = vmatprep.subr.bf16.mxu1 %v1109_v1 }
 0x2ee   :  { %v517_v11 = vrot.slane %v516_v10, 4 }
 0x2ef   :  { %v1015_v12 = vpop.eup %1014 }
 0x2f0   :  { %v439_v9 = vsel %vm418_vm14, %v1015_v12, 0.0  ;;  %v518_v13 = vadd.f32 %v517_v11, %v516_v10 }
 0x2f1   :  { %v1017_v14 = vpop.eup %1016  ;;  %v440_v15 = vrot.slane %v439_v9, 4 }
 0x2f2   :  { %v1019_v16 = vpop.eup %1018  ;;  %v523_v17 = vsel %vm483_vm9, %v1017_v14, 0.0  ;;  %v519_v18 = vrot.slane %v518_v13, 2 }
 0x2f3   :  { %v441_v19 = vadd.f32 %v440_v15, %v439_v9  ;;  %v524_v20 = vsel %vm483_vm9, %v1019_v16, 0.0 }
 0x2f4   :  { %v1021_v6 = vpop.eup %1020  ;;  %v525_v21 = vadd.f32 %v524_v20, %v523_v17  ;;  %v520_v22 = vadd.f32 %v519_v18, %v518_v13 }
 0x2f5   :  { %v442_v23 = vrot.slane %v441_v19, 2  ;;  %v446_v24 = vsel %vm418_vm14, %v1021_v6, 0.0 }
 0x2f6   :  { %v526_v25 = vrot.slane %v525_v21, 4  ;;  %v447_v26 = vrot.slane %v446_v24, 4  ;;  %v521_v27 = vrot.slane %v520_v22, 1 }
 0x2f7   :  { %v443_v28 = vadd.f32 %v442_v23, %v441_v19 }
 0x2f8   :  { %v448_v29 = vadd.f32 %v447_v26, %v446_v24  ;;  %v522_v30 = vadd.f32 %v521_v27, %v520_v22  ;;  %v527_v31 = vadd.f32 %v526_v25, %v525_v21 }
 0x2f9   :  { %v444_v32 = vrot.slane %v443_v28, 1 }
 0x2fa   :  { %1022 = vrcp.f32 %v522_v30  ;;  %v528_v33 = vrot.slane %v527_v31, 2  ;;  %v449_v36 = vrot.slane %v448_v29, 2 }
 0x2fb   :  { %v445_v34 = vadd.f32 %v444_v32, %v443_v28 }
 0x2fc   :  { %v529_v39 = vadd.f32 %v528_v33, %v527_v31  ;;  %v450_v43 = vadd.f32 %v449_v36, %v448_v29 }
 0x2fd   :  { %1024 = vrcp.f32 %v445_v34 }
 0x2fe   :  { %v530_v41 = vrot.slane %v529_v39, 1  ;;  %v451_v46 = vrot.slane %v450_v43, 1 }
 0x300   :  { %v531_v44 = vadd.f32 %v530_v41, %v529_v39  ;;  %v452_v49 = vadd.f32 %v451_v46, %v450_v43 }
 0x302   :  { %1026 = vrcp.f32 %v531_v44 }
 0x303   :  { %1028 = vrcp.f32 %v452_v49 }
 0x307   :  { %v1023_v48 = vpop.eup %1022 }
 0x308   :  { %v534_v50 = vmul.f32 %v1023_v48, %v1011_v5  ;;  %v535_v51 = vmul.f32 %v1023_v48, %v1013_v7 }
 0x30a   :  { %v1025_v52 = vpop.eup %1024  ;;  %540 = vperm.xlu1 %981, %v534_v50   ;;  %545 = vperm.xlu0 %982, %v535_v51  }
 0x30b   :  { %v455_v54 = vmul.f32 %v1025_v52, %v1015_v12 }
 0x30e   :  { %983 = vset.pattern.permute.xlu1 %v1108_v0 }
 0x30f   :  { %v1027_v55 = vpop.eup %1026  ;;  %459 = vperm.xlu1 %983, %v455_v54  }
 0x310   :  { %v536_v57 = vmul.f32 %v1027_v55, %v1017_v14  ;;  %v537_v59 = vmul.f32 %v1027_v55, %v1019_v16  ;;  %v1029_v60 = vpop.eup %1028  ;;  %v586_v55 = vsub.s32 3, %v1232_v58 }
 0x311   :  { %v456_v53 = vmul.f32 %v1029_v60, %v1021_v6 }
 0x313   :  { %984 = vset.pattern.permute.xlu1 %v1112_v38  ;;  %v1001_v38 = vld [vmem:[#allocation5 + $0x60] sm:$0xff]  }
 0x314   :  { %550 = vperm.xlu1 %984, %v536_v57   ;;  %933 = vmatpush3.bf16.msra.mxu1 %v1001_v38  ;;  %v587_v57 = vrot.slane %v1238_v62, %v586_v55  ;;  %v1002_v38 = vld [vmem:[#allocation5 + $0xb8] sm:$0xff]  }
 0x315   :  { %939 = vmatpush3.bf16.msra.mxu0 %v1002_v38 }
 0x316   :  { %940 = vmatprep.subr.bf16.mxu0 %v1109_v1 }
 0x318   :  { %555 = vperm.xlu1 %984, %v537_v59  }
 0x31c   :  { %985 = vset.pattern.permute.xlu1 %v1108_v0 }
 0x31d   :  { %464 = vperm.xlu1 %985, %v456_v53  }
 0x385   :  { %v541_v3 = vpop.permute.xlu1 %540  ;;  %v546_v4 = vpop.permute.xlu0 %545 }
 0x386   :  { %v558_v5 = vmul.f32 %v541_v3, %v1203_v40  ;;  %v559_v0 = vmul.f32 %v546_v4, %v1207_v42  ;;  %v1003_v3 = vld [vmem:[#allocation5 + $0xb0] sm:$0xff]  }
 0x387   :  { %941 = vmatpush3.bf16.msra.mxu0 %v1003_v3 }
 0x388   :  { %v562_v7 = vsel %vm132_vm4, %v558_v5, 0.0  ;;  %v563_v8 = vsel %vm132_vm4, %v559_v0, 0.0  ;;  %942 = vmatprep.subr.bf16.mxu0 %v1109_v1 }
 0x389   :  { %v564_v2 = vadd.f32 %v563_v8, %v562_v7 }
 0x38a   :  { %v460_v10 = vpop.permute.xlu1 %459 }
 0x38b   :  { %v467_v11 = vmul.f32 %v460_v10, %v1196_v35  ;;  %v565_v9 = vrot.slane %v564_v2, 4  ;;  %v1005_v10 = vld [vmem:[#allocation5 + $0xa0] sm:$0xff]  }
 0x38d   :  { %v469_v12 = vsel %vm132_vm4, %v467_v11, 0.0  ;;  %v566_v16 = vadd.f32 %v565_v9, %v564_v2  ;;  %v1004_v2 = vld [vmem:[#allocation5 + $0xa8] sm:$0xff]   ;;  %v1006_v11 = vld [vmem:[#allocation5 + $0x98] sm:$0xff]  }
 0x38e   :  { %v470_v13 = vrot.slane %v469_v12, 4  ;;  %943 = vmatpush3.bf16.msra.mxu0 %v1004_v2  ;;  %v1008_v9 = vld [vmem:[#allocation5 + $0x88] sm:$0xff]  }
 0x38f   :  { %v551_v14 = vpop.permute.xlu1 %550  ;;  %v567_v19 = vrot.slane %v566_v16, 2  ;;  %944 = vmatprep.subr.bf16.mxu0 %v1109_v1 }
 0x390   :  { %v471_v15 = vadd.f32 %v470_v13, %v469_v12  ;;  %v560_v17 = vmul.f32 %v551_v14, %v1212_v45  ;;  %v1007_v12 = vld [vmem:[#allocation5 + $0x90] sm:$0xff]   ;;  %v1009_v13 = vld [vmem:[#allocation5 + $0x80] sm:$0xff]  }
 0x391   :  { %v568_v25 = vadd.f32 %v567_v19, %v566_v16 }
 0x392   :  { %v472_v18 = vrot.slane %v471_v15, 2  ;;  %v571_v20 = vsel %vm132_vm4, %v560_v17, 0.0  ;;  %945 = vmatpush3.bf16.msra.mxu0 %v1005_v10  ;;  %v679_v17 = vsub.s32 4, %v1232_v58 }
 0x393   :  { %v556_v40 = vpop.permute.xlu1 %555  ;;  %v569_v30 = vrot.slane %v568_v25, 1  ;;  %946 = vmatprep.subr.bf16.mxu0 %v1109_v1 }
 0x394   :  { %v561_v42 = vmul.f32 %v556_v40, %v1216_v47  ;;  %v473_v35 = vadd.f32 %v472_v18, %v471_v15  ;;  %v684_v40 = vsub.s32 5, %v1232_v58  ;;  %v680_v18 = vrot.slane %v1238_v62, %v679_v17 }
 0x395   :  { %v570_v34 = vadd.f32 %v569_v30, %v568_v25 }
 0x396   :  { %v572_v6 = vsel %vm132_vm4, %v561_v42, 0.0  ;;  %v474_v45 = vrot.slane %v473_v35, 1  ;;  %947 = vmatpush3.bf16.msra.mxu0 %v1006_v11 }
 0x397   :  { %v573_v21 = vadd.f32 %v572_v6, %v571_v20  ;;  %948 = vmatprep.subr.bf16.mxu0 %v1109_v1  ;;  %v685_v20 = vrot.slane %v1238_v62, %v684_v40 }
 0x398   :  { %v465_v22 = vpop.permute.xlu1 %464  ;;  %v475_v32 = vadd.f32 %v474_v45, %v473_v35 }
 0x399   :  { %v574_v23 = vrot.slane %v573_v21, 4  ;;  %v468_v24 = vmul.f32 %v465_v22, %v1198_v37 }
 0x39a   :  { %v580_v41 = vadd.f32 %v570_v34, %v475_v32  ;;  %949 = vmatpush3.bf16.msra.mxu0 %v1007_v12 }
 0x39b   :  { %v575_v26 = vadd.f32 %v574_v23, %v573_v21  ;;  %v476_v27 = vsel %vm132_vm4, %v468_v24, 0.0  ;;  %950 = vmatprep.subr.bf16.mxu0 %v1109_v1 }
 0x39c   :  { %v477_v28 = vrot.slane %v476_v27, 4  ;;  %v582_v37 = vpack.c.bf16 %v580_v41, %v580_v41 }
 0x39d   :  { %v576_v29 = vrot.slane %v575_v26, 2 }
 0x39e   :  { %v478_v47 = vadd.f32 %v477_v28, %v476_v27  ;;  %v590_v50 = vunpack.c.l.b16 %v582_v37  ;;  %951 = vmatpush3.bf16.msra.mxu0 %v1008_v9 }
 0x39f   :  { %v577_v31 = vadd.f32 %v576_v29, %v575_v26  ;;  %952 = vmatprep.subr.bf16.mxu0 %v1109_v1  ;;  %v690_v1 = vsub.s32 6, %v1232_v58 }
 0x3a0   :  { %v479_v33 = vrot.slane %v478_v47, 2 }
 0x3a1   :  { %v578_v36 = vrot.slane %v577_v31, 1  ;;  %v691_v22 = vrot.slane %v1238_v62, %v690_v1 }
 0x3a2   :  { %v480_v39 = vadd.f32 %v479_v33, %v478_v47  ;;  %953 = vmatpush3.bf16.msra.mxu0 %v1009_v13 }
 0x3a3   :  { %v579_v44 = vadd.f32 %v578_v36, %v577_v31 }
 0x3a4   :  { %v481_v43 = vrot.slane %v480_v39, 1 }
 0x3a6   :  { %v482_v46 = vadd.f32 %v481_v43, %v480_v39 }
 0x3a8   :  { %v581_v48 = vadd.f32 %v579_v44, %v482_v46 }
 0x3aa   :  { %v583_v49 = vpack.c.bf16 %v581_v48, %v581_v48 }
 0x3ac   :  { %v591_v51 = vunpack.c.l.b16 %v583_v49 }
 0x3ae   :  { %v593_v52 = vsel %vm592_vm15, %v591_v51, %v590_v50 }
 0x3af   :  { %v594_v54 = vpack.c.b16 %v593_v52, %v593_v52 }
 0x3b1   :  { %935 = vmatmul.mubr.msk.bf16.vlgmr.msra.gmra.mxu1 %vm132_vm4, %v594_v54 }
 0x471   :  { %v656_v59 = vpop.f32.mrf.mxu1 }
 0x472   :  { %v657_v60 = vadd.f32 %v656_v59, %v587_v57 }
 0x473   :  { %v936_v53 = vpop.f32.mrf.mxu1 }
 0x474   :  { %v663_v56 = vsel %vm662_vm0, %v657_v60, 0.0 }
 0x475   :  { %664 = vadd.xlane.f32.xlu1 %v663_v56  ;;  %v659_v61 = vpop.f32.mrf.mxu1 }
 0x477   :  { %v937_v63 = vpop.f32.mrf.mxu1 }
 0x4fe   :  { %v665_v4 = vpop.xlane.xlu1 %664 }
 0x4ff   :  { %v667_v5 = vmul.f32 0.0078125, %v665_v4 }
 0x501   :  { %v668_v0 = vsub.f32 %v657_v60, %v667_v5 }
 0x503   :  { %v669_v7 = vmul.f32 %v668_v0, %v668_v0 }
 0x505   :  { %v670_v8 = vsel %vm662_vm0, %v669_v7, 0.0 }
 0x506   :  { %671 = vadd.xlane.f32.xlu0 %v670_v8 }
 0x58f   :  { %v672_v14 = vpop.xlane.xlu0 %671 }
 0x590   :  { %v673_v15 = vmul.f32 0.0078125, %v672_v14 }
 0x592   :  { %v674_v16 = vadd.f32 1e-05, %v673_v15 }
 0x594   :  { %1030 = vrsqrt.f32 %v674_v16 }
 0x5a1   :  { %v1031_v42 = vpop.eup %1030 }
 0x5a2   :  { %v676_v19 = vmul.f32 %v1031_v42, %v668_v0 }
 0x5a4   :  { %v681_v6 = vmul.f32 %v680_v18, %v676_v19 }
 0x5a6   :  { %v686_v21 = vadd.f32 %v685_v20, %v681_v6 }
 0x5a8   :  { %v687_v35 = vpack.c.bf16 %v686_v21, %v686_v21 }
 0x5aa   :  { %955 = vmatmul.mubr.bf16.vlgmr.msra.gmra.mxu0 %v687_v35 }
 0x66a   :  { %v774_v23 = vpop.f32.mrf.mxu0 }
 0x66b   :  { %v775_v24 = vadd.f32 %v774_v23, %v691_v22 }
 0x66c   :  { %v956_v25 = vpop.f32.mrf.mxu0 }
 0x66d   :  { %v845_v26 = vmul.f32 -1.442695, %v775_v24 }
 0x66e   :  { %v777_v27 = vpop.f32.mrf.mxu0 }
 0x66f   :  { %1032 = vpow2.f32 %v845_v26 }
 0x670   :  { %v957_v45 = vpop.f32.mrf.mxu0 }
 0x67c   :  { %v1033_v28 = vpop.eup %1032 }
 0x67d   :  { %v783_v29 = vadd.f32 1.0, %v1033_v28 }
 0x67f   :  { %1034 = vrcp.f32 %v783_v29 }
 0x68c   :  { %v1035_v30 = vpop.eup %1034 }
 0x68d   :  { %786 = vst [vmem:[#allocation7] sm:$0x3] %v1035_v30 }
 0x68e   :  { %1087 = shalt.err (!%p1084_p0)
}
 0x68f   :  { %796 = dma.vmem_to_hbm [thread:$0]  %s794_s6, 32, %s1312_s4, [#allocation4]  }
 0x690   :  { %1100 = dma.done.wait [#allocation4], 32  }
 0x691   :  { %1101 = vsyncadd [#allocation4], 4294967264 }
 0x692   :  { %800 = vsyncpa [#allocation3], 1 }
 0x693   :  { %801 = vsyncpa [#allocation6], 1 }
 0x694   :  { %802 = vsyncpa [#allocation4], 1 }

</bundles_post_ra>
